<compile_context>
chip_gen: v5e
topology: v5e:2x2
jax: 0.10.0
libtpu: 0.0.40
codegen_flags: <defaults>
</compile_context>

<pallas_src>
import functools

import jax
import jax.numpy as jnp
from jax.experimental import pallas as pl
from jax.experimental.pallas import tpu as pltpu


def _round_up(x, m):
    return ((x + m - 1) // m) * m


def _mlp_kernel(x_ref, w1_ref, b1_ref, w2_ref, b2_ref, o_ref, *, is_cls, out_valid):
    # Layer 1: Linear (bf16 operands on the MXU, f32 accumulate) + LeakyReLU(0.1) in f32.
    h = jnp.dot(x_ref[...], w1_ref[...], preferred_element_type=jnp.float32)
    h = h + b1_ref[...]
    h = jnp.where(h >= 0, h, 0.1 * h)

    # Layer 2: Linear (bf16 operands, f32 accumulate).
    out = jnp.dot(h.astype(jnp.bfloat16), w2_ref[...],
                  preferred_element_type=jnp.float32)
    out = out + b2_ref[...]

    if is_cls:
        # log_softmax over the feature axis, numerically stable, restricted to the
        # `out_valid` real columns (the rest are zero-padding for lane density).
        padded = out.shape[-1] != out_valid
        if padded:
            col = jax.lax.broadcasted_iota(jnp.int32, out.shape, 1)
            valid = col < out_valid
            masked = jnp.where(valid, out, -jnp.inf)
        else:
            masked = out
        m = jnp.max(masked, axis=1, keepdims=True)
        s = out - m
        e = jnp.exp(s)
        if padded:
            e = jnp.where(valid, e, 0.0)
        lse = jnp.log(jnp.sum(e, axis=1, keepdims=True))
        out = s - lse

    o_ref[...] = out.astype(o_ref.dtype)


_VMEM_WORKING_BUDGET = 48 << 20  # conservative: stays under v7x's 64 MiB physical VMEM


def mlp_forward(x, w1, b1, w2, b2, *, is_cls=False, tile_m=256):
    """Fused 2-layer MLP forward on TPU via Pallas.

    x : (B, in_feat) float32
    w1: (in_feat, hidden), b1: (1, hidden)
    w2: (hidden, out),     b2: (1, out)
    (Weights are stored (in, out), i.e. y = x @ W + b == PyTorch's x @ W.T with W (out, in).)
    """
    B, in_feat = x.shape
    hidden = w1.shape[1]
    out_size = w2.shape[1]

    # Lane-dense output: pad the output feature dim to a multiple of 128 (sliced off below).
    out_p = _round_up(out_size, 128)
    if out_p != out_size:
        w2 = jnp.pad(w2, ((0, 0), (0, out_p - out_size)))
        b2 = jnp.pad(b2, ((0, 0), (0, out_p - out_size)))

    # bf16 MXU operands (also halves weight/activation HBM bytes); biases stay f32.
    x_bf = x.astype(jnp.bfloat16)
    w1_bf = w1.astype(jnp.bfloat16)
    w2_bf = w2.astype(jnp.bfloat16)
    b1_f32 = b1.astype(jnp.float32)
    b2_f32 = b2.astype(jnp.float32)

    # Large, MXU-filling batch tile; shrink only if the VMEM working set would overflow.
    tm = min(tile_m, _round_up(B, 8))
    weight_bytes = w1_bf.nbytes + w2_bf.nbytes + b1_f32.nbytes + b2_f32.nbytes

    def vmem_needed(t):
        return (weight_bytes                       # resident, single-buffered weights
                + 2 * t * in_feat * 2              # double-buffered x tiles (bf16)
                + 2 * t * out_p * 4                # double-buffered out tiles (f32)
                + t * (in_feat + hidden + out_p) * 4)   # in-kernel temporaries (approx)

    while tm > 128 and vmem_needed(tm) > _VMEM_WORKING_BUDGET:
        tm = max(128, tm // 2)
    # TODO(synk): if the weights alone exceed the VMEM budget (very large in_feat/hidden),
    # add K/N reduction grid axes with a pl.when-initialized f32 accumulator instead of
    # keeping the weights fully resident.

    grid = (pl.cdiv(B, tm),)
    vmem_limit = int(min(max(vmem_needed(tm) + (4 << 20), 32 << 20), 64 << 20))

    flops = 2 * B * (in_feat * hidden + hidden * out_p)
    transcendentals = B * out_p if is_cls else 0
    bytes_accessed = (x_bf.nbytes + w1_bf.nbytes + b1_f32.nbytes
                      + w2_bf.nbytes + b2_f32.nbytes + B * out_p * 4)

    kernel = functools.partial(_mlp_kernel, is_cls=is_cls, out_valid=out_size)
    # Whole array resident in VMEM, copied once (no per-grid-step DMA / double buffering).
    vmem_full = pl.BlockSpec(memory_space=pltpu.MemorySpace.VMEM)

    out_padded = pl.pallas_call(
        kernel,
        out_shape=jax.ShapeDtypeStruct((B, out_p), jnp.float32),
        grid_spec=pltpu.PrefetchScalarGridSpec(
            num_scalar_prefetch=0,
            grid=grid,
            in_specs=[
                pl.BlockSpec((tm, in_feat), lambda i: (i, 0)),  # x tile over batch
                vmem_full,   # w1
                vmem_full,   # b1
                vmem_full,   # w2
                vmem_full,   # b2
            ],
            out_specs=pl.BlockSpec((tm, out_p), lambda i: (i, 0)),
        ),
        compiler_params=pltpu.CompilerParams(
            dimension_semantics=("parallel",),
            vmem_limit_bytes=vmem_limit),
        cost_estimate=pl.CostEstimate(
            flops=flops,
            transcendentals=transcendentals,
            bytes_accessed=bytes_accessed),
    )(x_bf, w1_bf, b1_f32, w2_bf, b2_f32)

    if out_p != out_size:
        out_padded = out_padded[:, :out_size]
    return out_padded


def init_params(key, in_feat, hidden_size, out_size):
    """Deterministic PyTorch-Linear-style init: U(-1/sqrt(fan_in), 1/sqrt(fan_in))."""
    k1, k2, k3, k4 = jax.random.split(key, 4)
    bnd1 = 1.0 / jnp.sqrt(in_feat)
    bnd2 = 1.0 / jnp.sqrt(hidden_size)
    w1 = jax.random.uniform(k1, (in_feat, hidden_size), jnp.float32, -bnd1, bnd1)
    b1 = jax.random.uniform(k2, (1, hidden_size), jnp.float32, -bnd1, bnd1)
    w2 = jax.random.uniform(k3, (hidden_size, out_size), jnp.float32, -bnd2, bnd2)
    b2 = jax.random.uniform(k4, (1, out_size), jnp.float32, -bnd2, bnd2)
    return w1, b1, w2, b2


def mlp_reference(x, w1, b1, w2, b2, is_cls):
    """Pure-JAX reference mirroring the kernel's bf16-operand / f32-accumulate arithmetic."""
    f32 = jnp.float32
    xb = x.astype(jnp.bfloat16).astype(f32)
    w1b = w1.astype(jnp.bfloat16).astype(f32)
    w2b = w2.astype(jnp.bfloat16).astype(f32)
    h = xb @ w1b + b1
    h = jnp.where(h >= 0, h, 0.1 * h)
    hb = h.astype(jnp.bfloat16).astype(f32)
    out = hb @ w2b + b2
    if is_cls:
        out = jax.nn.log_softmax(out, axis=1)
    return out


if __name__ == "__main__":
    # Small shapes consistent with the module: MLP(in_feat=32, hidden=64, out=16, layers=2)
    B, in_feat, hidden_size, out_size = 8, 32, 64, 16

    key = jax.random.PRNGKey(0)
    kx, kp = jax.random.split(key)
    x = jax.random.normal(kx, (B, in_feat), dtype=jnp.float32)
    w1, b1, w2, b2 = init_params(kp, in_feat, hidden_size, out_size)

    # is_cls=False path (plain MLP output)
    y = mlp_forward(x, w1, b1, w2, b2, is_cls=False)
    jax.block_until_ready(y)
    y_ref = mlp_reference(x, w1, b1, w2, b2, is_cls=False)
    assert y.shape == (B, out_size)
    assert jnp.allclose(y, y_ref, atol=2e-3, rtol=2e-3), "mismatch (is_cls=False)"

    # is_cls=True path (log_softmax over dim=1)
    y_cls = mlp_forward(x, w1, b1, w2, b2, is_cls=True)
    jax.block_until_ready(y_cls)
    y_cls_ref = mlp_reference(x, w1, b1, w2, b2, is_cls=True)
    assert jnp.allclose(y_cls, y_cls_ref, atol=2e-3, rtol=2e-3), "mismatch (is_cls=True)"

    print("KERNEL_OK")
</pallas_src>

<mosaic_0001>
module attributes {stable_mosaic.version = 11 : i64} {
  func.func @_mlp_kernel(%arg0: i32, %arg1: memref<8x32xbf16, #tpu.memory_space<vmem>>, %arg2: memref<32x64xbf16, #tpu.memory_space<vmem>>, %arg3: memref<1x64xf32, #tpu.memory_space<vmem>>, %arg4: memref<64x128xbf16, #tpu.memory_space<vmem>>, %arg5: memref<1x128xf32, #tpu.memory_space<vmem>>, %arg6: memref<8x128xf32, #tpu.memory_space<vmem>>) attributes {dimension_semantics = [#tpu.dimension_semantics<parallel>], iteration_bounds = array<i64: 1>, scalar_prefetch = 0 : i64, scratch_operands = 0 : i64, tpu.core_type = #tpu.core_type<tc>, window_params = [{transform_indices = @transform_0, window_bounds = array<i64: 8, 32>}, {pipeline_mode = #tpu.pipeline_mode<synchronous>, transform_indices = @transform_1, window_bounds = array<i64: 32, 64>}, {pipeline_mode = #tpu.pipeline_mode<synchronous>, transform_indices = @transform_2, window_bounds = array<i64: 1, 64>}, {pipeline_mode = #tpu.pipeline_mode<synchronous>, transform_indices = @transform_3, window_bounds = array<i64: 64, 128>}, {pipeline_mode = #tpu.pipeline_mode<synchronous>, transform_indices = @transform_4, window_bounds = array<i64: 1, 128>}, {transform_indices = @transform_5, window_bounds = array<i64: 8, 128>}]} {
    %c0 = arith.constant 0 : index
    %c0_0 = arith.constant 0 : index
    %0 = vector.load %arg1[%c0, %c0_0] : memref<8x32xbf16, #tpu.memory_space<vmem>>, vector<8x32xbf16>
    %c0_1 = arith.constant 0 : index
    %c0_2 = arith.constant 0 : index
    %1 = vector.load %arg2[%c0_1, %c0_2] : memref<32x64xbf16, #tpu.memory_space<vmem>>, vector<32x64xbf16>
    %cst = arith.constant dense<0.000000e+00> : vector<8x64xf32>
    %2 = tpu.matmul %0, %1, %cst {dimension_numbers = #tpu.dot_dimension_numbers<[1], [0], [0], [1], [0, 0, 1, 1], [], []>} : vector<8x32xbf16>, vector<32x64xbf16>, vector<8x64xf32> -> vector<8x64xf32>
    %c0_3 = arith.constant 0 : index
    %c0_4 = arith.constant 0 : index
    %3 = vector.load %arg3[%c0_3, %c0_4] : memref<1x64xf32, #tpu.memory_space<vmem>>, vector<1x64xf32>
    %4 = vector.broadcast %3 : vector<1x64xf32> to vector<8x64xf32>
    %5 = arith.addf %2, %4 : vector<8x64xf32>
    %cst_5 = arith.constant 0.000000e+00 : f32
    %6 = vector.broadcast %cst_5 : f32 to vector<8x64xf32>
    %7 = arith.cmpf oge, %5, %6 : vector<8x64xf32>
    %cst_6 = arith.constant 1.000000e-01 : f32
    %8 = vector.broadcast %cst_6 : f32 to vector<8x64xf32>
    %9 = arith.mulf %8, %5 : vector<8x64xf32>
    %10 = arith.select %7, %5, %9 : vector<8x64xi1>, vector<8x64xf32>
    %11 = arith.truncf %10 : vector<8x64xf32> to vector<8x64xbf16>
    %c0_7 = arith.constant 0 : index
    %c0_8 = arith.constant 0 : index
    %12 = vector.load %arg4[%c0_7, %c0_8] : memref<64x128xbf16, #tpu.memory_space<vmem>>, vector<64x128xbf16>
    %cst_9 = arith.constant dense<0.000000e+00> : vector<8x128xf32>
    %13 = tpu.matmul %11, %12, %cst_9 {dimension_numbers = #tpu.dot_dimension_numbers<[1], [0], [0], [1], [0, 0, 1, 1], [], []>} : vector<8x64xbf16>, vector<64x128xbf16>, vector<8x128xf32> -> vector<8x128xf32>
    %c0_10 = arith.constant 0 : index
    %c0_11 = arith.constant 0 : index
    %14 = vector.load %arg5[%c0_10, %c0_11] : memref<1x128xf32, #tpu.memory_space<vmem>>, vector<1x128xf32>
    %15 = vector.broadcast %14 : vector<1x128xf32> to vector<8x128xf32>
    %16 = arith.addf %13, %15 : vector<8x128xf32>
    %c0_12 = arith.constant 0 : index
    %c0_13 = arith.constant 0 : index
    %17 = vector.load %arg6[%c0_12, %c0_13] : memref<8x128xf32, #tpu.memory_space<vmem>>, vector<8x128xf32>
    tpu.vector_store %arg6[%c0_12, %c0_13], %16 {strides = array<i32>} : memref<8x128xf32, #tpu.memory_space<vmem>>, vector<8x128xf32>,
    return
  }
  func.func @transform_0(%arg0: i32) -> (i32, i32) {
    %c0_i32 = arith.constant 0 : i32
    %c0_i32_0 = arith.constant 0 : i32
    return %arg0, %c0_i32 : i32, i32
  }
  func.func @transform_1(%arg0: i32) -> (i32, i32) {
    %c0_i32 = arith.constant 0 : i32
    %c0_i32_0 = arith.constant 0 : i32
    %c0_i32_1 = arith.constant 0 : i32
    return %c0_i32, %c0_i32_0 : i32, i32
  }
  func.func @transform_2(%arg0: i32) -> (i32, i32) {
    %c0_i32 = arith.constant 0 : i32
    %c0_i32_0 = arith.constant 0 : i32
    %c0_i32_1 = arith.constant 0 : i32
    return %c0_i32, %c0_i32_0 : i32, i32
  }
  func.func @transform_3(%arg0: i32) -> (i32, i32) {
    %c0_i32 = arith.constant 0 : i32
    %c0_i32_0 = arith.constant 0 : i32
    %c0_i32_1 = arith.constant 0 : i32
    return %c0_i32, %c0_i32_0 : i32, i32
  }
  func.func @transform_4(%arg0: i32) -> (i32, i32) {
    %c0_i32 = arith.constant 0 : i32
    %c0_i32_0 = arith.constant 0 : i32
    %c0_i32_1 = arith.constant 0 : i32
    return %c0_i32, %c0_i32_0 : i32, i32
  }
  func.func @transform_5(%arg0: i32) -> (i32, i32) {
    %c0_i32 = arith.constant 0 : i32
    %c0_i32_0 = arith.constant 0 : i32
    return %arg0, %c0_i32 : i32, i32
  }
}

</mosaic_0001>

<bundles_post_ra>
// kernel: tpu_custom_call.1
= control target key start
LH: loop header
LB: loop body
LE: loop exit
PB: predicated region body
PF: predicated region fallthrough
CT: control target
= control target key end

     0   :  { %10 = vsyncpa [#allocation3], 0  ;;  %s377_s0 = inlined_call_operand.hbm [shape: bf16[8,32], index: 0, kind: input, shape index: {}]   ;;  %s378_s1 = inlined_call_operand.hbm [shape: bf16[32,64], index: 1, kind: input, shape index: {}]   ;;  %s379_s2 = inlined_call_operand.vmem [shape: f32[1,64], index: 2, kind: input, shape index: {}]   ;;  %s380_s3 = inlined_call_operand.hbm [shape: bf16[64,128], index: 3, kind: input, shape index: {}]   ;;  %s381_s4 = inlined_call_operand.vmem [shape: f32[1,128], index: 4, kind: input, shape index: {}]   ;;  %s382_s5 = inlined_call_operand.hbm [shape: f32[8,128], index: 5, kind: output, shape index: {}]  }
   0x1   :  { %11 = vsyncpa [#allocation6], 0  ;;  %s28_s20 = sshll.u32 %s378_s1, 4  ;;  %s29_s20 = int_to_ptr.hbm [resolvable:$true] %s28_s20 }
   0x2   :  { %12 = vsyncpa [#allocation4], 0  ;;  %s323_s21 = smov [#allocation5]   ;;  %s18_s25 = sshll.u32 %s377_s0, 4  ;;  %s19_s25 = int_to_ptr.hbm [resolvable:$true] %s18_s25 }
   0x3   :  { %s30_s22 = sshll.u32 %s323_s21, 4  ;;  %s324_s26 = smov 64   ;;  %s31_s22 = int_to_ptr.vmem [resolvable:$true] %s30_s22 }
   0x4   :  { %s325_s27 = smov 4   ;;  %s326_s28 = smov [#allocation2]  }
   0x5   :  { %36 = dma.hbm_to_vmem [thread:$0]  %s29_s20, 256, %s31_s22, [#allocation6], %s324_s26, %s324_s26, %s325_s27  }
   0x6   :  { %s20_s29 = sshll.u32 %s326_s28, 4  ;;  %s43_s7 = sshll.u32 %s380_s3, 4  ;;  %s21_s29 = int_to_ptr.vmem [resolvable:$true] %s20_s29  ;;  %s44_s7 = int_to_ptr.hbm [resolvable:$true] %s43_s7 }
   0x7   :  { %23 = dma.hbm_to_vmem [thread:$0]  %s19_s25, 64, %s21_s29, [#allocation3]  }
   0x8   :  { %s327_s1 = smov [#allocation7]  }
   0x9   :  { %s45_s8 = sshll.u32 %s327_s1, 4  ;;  %s46_s8 = int_to_ptr.vmem [resolvable:$true] %s45_s8 }
   0xa   :  { %51 = dma.hbm_to_vmem [thread:$0]  %s44_s7, 512, %s46_s8, [#allocation6], %s324_s26, %s324_s26, %s325_s27  }
   0xb   :  { %317 = dma.done.wait [#allocation3], 64  }
   0xc   :  { %318 = vsyncadd [#allocation3], 4294967232 }
   0xd   :  { %319 = dma.done.wait [#allocation6], 768  }
   0xe   :  { %320 = vsyncadd [#allocation6], 4294966528  ;;  %v208_v0 = vld [vmem:[#allocation5 + $0x8] sm:$0xff]  ;;  %v207_v2 = vld [vmem:[#allocation5] sm:$0xff]  ;;  %vm88_vm0 = vcmask 261120   ;;  %vm145_vm2 = vcmask 523264  }
   0xf   :  { %v212_v1 = vld [vmem:[#allocation7 + $0x18] sm:$0xff]  ;;  %98 = vmatpush.bf16.msra.mxu0 %v208_v0  ;;  %v211_v3 = vld [vmem:[#allocation7 + $0x10] sm:$0xff]  ;;  %v67_v4 = vld [vmem:[#allocation2] sm:$0xf]  ;;  %s328_s11 = smov [#allocation8]   ;;  %s170_s15 = sshll.u32 %s382_s5, 4  ;;  %s171_s15 = int_to_ptr.hbm [resolvable:$true] %s170_s15 }
  0x10   :  { %153 = vmatpush.bf16.msra.mxu1 %v212_v1  ;;  %v210_v5 = vld [vmem:[#allocation7 + $0x8] sm:$0xff]  ;;  %v209_v6 = vld [vmem:[#allocation7] sm:$0xff]  ;;  %s168_s12 = sshll.u32 %s328_s11, 4  ;;  %s169_s12 = int_to_ptr.vmem [resolvable:$true] %s168_s12 }
  0x11   :  { %v219_v7 = vld [vmem:[%s379_s2] ss:$0 sm:$0xff] }
  0x12   :  { %v220_v14 = vld [vmem:[%s381_s4] ss:$0 sm:$0xff] }
  0x13   :  { %99 = vmatpush.bf16.msra.mxu0 %v207_v2 }
  0x14   :  { %154 = vmatpush.bf16.msra.mxu1 %v211_v3 }
  0x16   :  { %189 = vmatmul.msk.bf16.vlgmr.msra.gmra.mxu0 %vm88_vm0, %v67_v4 }
  0x18   :  { %155 = vmatpush.bf16.msra.mxu1 %v210_v5 }
  0x1c   :  { %156 = vmatpush.bf16.msra.mxu1 %v209_v6 }
  0x93   :  { %v101_v8 = vpop.f32.mrf.mxu0 }
  0x94   :  { %v102_v9 = vadd.f32 %v219_v7, %v101_v8 }
  0x96   :  { %vm105_vm1 = vcmp.ge.f32.partialorder %v102_v9, 0.0  ;;  %v106_v10 = vmul.f32 0.1, %v102_v9 }
  0x98   :  { %v107_v11 = vsel %vm105_vm1, %v102_v9, %v106_v10 }
  0x99   :  { %v108_v12 = vpack.c.bf16 %v107_v11, %v107_v11 }
  0x9b   :  { %v103_v13 = vpop.f32.mrf.mxu0  ;;  %206 = vmatmul.msk.bf16.vlgmr.msra.gmra.mxu1 %vm145_vm2, %v108_v12 }
 0x118   :  { %v158_v15 = vpop.f32.mrf.mxu1 }
 0x119   :  { %v159_v16 = vadd.f32 %v220_v14, %v158_v15 }
 0x11b   :  { %162 = vst [vmem:[#allocation8] sm:$0xff] %v159_v16 }
 0x11c   :  { %173 = dma.vmem_to_hbm [thread:$0]  %s169_s12, 128, %s171_s15, [#allocation4]  }
 0x120   :  { %v160_v17 = vpop.f32.mrf.mxu1 }
 0x121   :  { %321 = dma.done.wait [#allocation4], 128  }
 0x122   :  { %322 = vsyncadd [#allocation4], 4294967168 }
 0x123   :  { %178 = vsyncpa [#allocation3], 1 }
 0x124   :  { %179 = vsyncpa [#allocation6], 1 }
 0x125   :  { %180 = vsyncpa [#allocation4], 1 }

</bundles_post_ra>
